<compile_context>
chip_gen: v6e
topology: v6e:2x2x1
jax: 0.10.0
libtpu: 0.0.40
codegen_flags: <defaults>
</compile_context>

<pallas_src>
import functools

import jax
import jax.numpy as jnp
from jax.experimental import pallas as pl
from jax.experimental.pallas import tpu as pltpu


def _round_up(x, m):
    return ((x + m - 1) // m) * m


# ---------------------------------------------------------------------------
# One-time self-check of pltpu.roll's lane-shift convention (expected: np.roll,
# i.e. result[i] = input[i - shift]).  One tiny cached compile; guarantees the
# conv taps shift in the right direction regardless of backend/version.
# ---------------------------------------------------------------------------
def _roll_probe_kernel(x_ref, o_ref):
    o_ref[...] = pltpu.roll(x_ref[...], shift=1, axis=1)


@functools.lru_cache(maxsize=None)
def _roll_is_numpy_convention():
    x = jnp.arange(8 * 128, dtype=jnp.float32).reshape(8, 128)
    y = pl.pallas_call(
        _roll_probe_kernel,
        out_shape=jax.ShapeDtypeStruct((8, 128), jnp.float32),
    )(x)
    return bool(jnp.array_equal(y, jnp.roll(x, 1, axis=1)))


# ---------------------------------------------------------------------------
# Kernel
# ---------------------------------------------------------------------------
def _spatial_attn_kernel(wa_ref, wm_ref, b_ref, x_ref, o_ref, *, H, W, lane_np):
    # wa_ref: SMEM (9,)  avg-channel 3x3 taps, pre-scaled by 1/C
    # wm_ref: SMEM (9,)  max-channel 3x3 taps
    # b_ref : SMEM (1,)  conv bias
    # x_ref : VMEM (nb, C, HW) batch block (flattened spatial dim, lane-dense)
    # o_ref : VMEM (nb, 1, HW)
    nb, C, HW = x_ref.shape
    Lp = _round_up(HW, 128)  # lane-aligned working width

    # ---- streaming channel reduction: static sublane chunks, f32 accumulators ----
    def read_chunk(c0, cs):
        return x_ref[:, c0:c0 + cs, :].astype(jnp.float32)  # (nb, cs, HW)

    cs0 = min(8, C)
    blk = read_chunk(0, cs0)
    s = jnp.sum(blk, axis=1)          # channel *sum*; 1/C folded into wa taps
    m = jnp.max(blk, axis=1)
    for c0 in range(cs0, C, 8):
        cs = min(8, C - c0)
        blk = read_chunk(c0, cs)
        s = s + jnp.sum(blk, axis=1)
        m = jnp.maximum(m, jnp.max(blk, axis=1))

    # ---- pad the two reduced maps once to the lane-aligned slab ----
    def pad_lanes(a):
        if Lp == HW:
            return a
        slab = jnp.zeros((nb, Lp), jnp.float32)
        return slab.at[:, :HW].set(a)

    fa = pad_lanes(s)   # "avg" feature (channel sum)
    fm = pad_lanes(m)   # "max" feature

    # ---- hoisted scalar parameter reads (SMEM) ----
    wa = [wa_ref[i] for i in range(9)]
    wm = [wm_ref[i] for i in range(9)]
    bias = b_ref[0]

    # ---- edge-validity masks from a single lane iota (shared over nb rows) ----
    idx = jax.lax.broadcasted_iota(jnp.int32, (1, Lp), 1)
    col = idx % W
    row = idx // W
    m_top = (row >= 1).astype(jnp.float32)       # neighbour row i-1 exists
    m_bot = (row <= H - 2).astype(jnp.float32)   # neighbour row i+1 exists
    m_lft = (col >= 1).astype(jnp.float32)       # neighbour col j-1 exists
    m_rgt = (col <= W - 2).astype(jnp.float32)   # neighbour col j+1 exists

    # ---- 3x3 cross-correlation with zero padding on the flattened slab ----
    # centre tap + bias
    acc = wa[4] * fa + wm[4] * fm + bias

    for dh in (-1, 0, 1):
        if dh != 0 and H < 2:
            continue
        for dw in (-1, 0, 1):
            if dh == 0 and dw == 0:
                continue
            if dw != 0 and W < 2:
                continue
            d = dh * W + dw
            shift = ((-d) if lane_np else d) % Lp
            ra = pltpu.roll(fa, shift=shift, axis=1) if shift else fa
            rm = pltpu.roll(fm, shift=shift, axis=1) if shift else fm
            factors = []
            if dh == -1:
                factors.append(m_top)
            if dh == 1:
                factors.append(m_bot)
            if dw == -1:
                factors.append(m_lft)
            if dw == 1:
                factors.append(m_rgt)
            mask = factors[0]
            for f in factors[1:]:
                mask = mask * f
            k = (dh + 1) * 3 + (dw + 1)
            acc = acc + mask * (wa[k] * ra + wm[k] * rm)

    out = jax.nn.sigmoid(acc[:, :HW])                  # (nb, HW)
    o_ref[...] = out[:, None, :].astype(o_ref.dtype)   # (nb, 1, HW), one dense store


# ---------------------------------------------------------------------------
# Wrapper
# ---------------------------------------------------------------------------
def spatial_attention(x, weight, bias, *, batch_block=None):
    """x: (N, C, H, W); weight: (1, 2, 3, 3); bias: (1,). Returns (N, 1, H, W)."""
    N, C, H, W = x.shape
    HW = H * W
    Lp = _round_up(HW, 128)
    itemsize = x.dtype.itemsize

    # Free, contiguous merge of the spatial dims -> lane-dense kernel layout.
    xf = x.reshape(N, C, HW)

    # Per-chip VMEM budget (v7x: 64 MiB total VMEM; v5e/v6e: 128 MiB).
    try:
        vmem_capacity = int(pltpu.get_tpu_info().vmem_capacity_bytes)
    except Exception:
        vmem_capacity = 64 << 20  # conservative (v7x) default

    # Holistic per-image VMEM cost: double-buffered in/out blocks + f32 working set.
    per_img = (2 * C * HW * itemsize      # input block, double-buffered
               + 2 * HW * itemsize        # output block, double-buffered
               + min(C, 8) * HW * 4       # f32 chunk read
               + 10 * Lp * 4)             # f32 accumulators / padded / rolled temps
    budget = min(vmem_capacity // 2, 48 << 20)

    if batch_block is None:
        nb = max(1, min(N, budget // max(per_img, 1)))
        if N >= 2:
            nb = min(nb, (N + 1) // 2)    # keep >=2 grid steps (megacore)
        while N % nb:                     # exact tiling of the batch axis
            nb -= 1
    else:
        nb = batch_block
    grid = (N // nb,)

    # Fold the mean's 1/C into the avg-channel taps; bias stays unscaled.
    w = weight.astype(jnp.float32).reshape(2, 9)
    w_avg = w[0] / jnp.float32(C)
    w_max = w[1]
    b = bias.astype(jnp.float32).reshape(1)

    lane_np = _roll_is_numpy_convention()
    kernel = functools.partial(_spatial_attn_kernel, H=H, W=W, lane_np=lane_np)

    vmem_limit = int(min(max(32 << 20, nb * per_img + (8 << 20)),
                         max(32 << 20, vmem_capacity * 3 // 4)))

    out_flat = pl.pallas_call(
        kernel,
        out_shape=jax.ShapeDtypeStruct((N, 1, HW), x.dtype),
        grid=grid,
        in_specs=[
            pl.BlockSpec(memory_space=pltpu.MemorySpace.SMEM),     # avg taps
            pl.BlockSpec(memory_space=pltpu.MemorySpace.SMEM),     # max taps
            pl.BlockSpec(memory_space=pltpu.MemorySpace.SMEM),     # bias
            pl.BlockSpec((nb, C, HW), lambda n: (n, 0, 0)),        # x block
        ],
        out_specs=pl.BlockSpec((nb, 1, HW), lambda n: (n, 0, 0)),
        compiler_params=pltpu.CompilerParams(
            dimension_semantics=("parallel",),
            vmem_limit_bytes=vmem_limit),
    )(w_avg, w_max, b, xf)

    return out_flat.reshape(N, 1, H, W)


# ---------------------------------------------------------------------------
# Pure-JAX reference and self-test
# ---------------------------------------------------------------------------
def reference(x, weight, bias):
    avg = jnp.mean(x, axis=1, keepdims=True)
    mx = jnp.max(x, axis=1, keepdims=True)
    cat = jnp.concatenate([avg, mx], axis=1)
    y = jax.lax.conv_general_dilated(
        cat, weight, window_strides=(1, 1), padding=((1, 1), (1, 1)),
        dimension_numbers=("NCHW", "OIHW", "NCHW"))
    return jax.nn.sigmoid(y + bias.reshape(1, -1, 1, 1))


if __name__ == "__main__":
    key = jax.random.PRNGKey(0)
    kx, kw, kb, kx2 = jax.random.split(key, 4)

    # Deterministic synthetic Conv2d(2 -> 1, k=3) parameters.
    fan_in = 2 * 3 * 3
    bound = 1.0 / (fan_in ** 0.5)
    weight = jax.random.uniform(kw, (1, 2, 3, 3), jnp.float32, -bound, bound)
    bias = jax.random.uniform(kb, (1,), jnp.float32, -bound, bound)

    # Primary config.
    N, C, H, W = 2, 4, 16, 16
    x = jax.random.normal(kx, (N, C, H, W), dtype=jnp.float32)
    out = jax.block_until_ready(spatial_attention(x, weight, bias))
    ref = reference(x, weight, bias)
    assert out.shape == (N, 1, H, W)
    assert jnp.allclose(out, ref, atol=1e-5, rtol=1e-5), "mismatch vs reference"

    # Second config: odd channel count, >1 image per grid step.
    x2 = jax.random.normal(kx2, (4, 6, 16, 16), dtype=jnp.float32)
    out2 = jax.block_until_ready(spatial_attention(x2, weight, bias))
    ref2 = reference(x2, weight, bias)
    assert jnp.allclose(out2, ref2, atol=1e-5, rtol=1e-5), "mismatch vs reference (cfg2)"

    print("KERNEL_OK")
</pallas_src>

<mosaic_0001>
module attributes {stable_mosaic.version = 11 : i64} {
  func.func @_roll_probe_kernel(%arg0: memref<8x128xf32, #tpu.memory_space<vmem>>, %arg1: memref<8x128xf32, #tpu.memory_space<vmem>>) attributes {dimension_semantics = [], scalar_prefetch = 0 : i64, scratch_operands = 0 : i64, tpu.core_type = #tpu.core_type<tc>} {
    %c0 = arith.constant 0 : index
    %c0_0 = arith.constant 0 : index
    %0 = vector.load %arg0[%c0, %c0_0] : memref<8x128xf32, #tpu.memory_space<vmem>>, vector<8x128xf32>
    %c1_i32 = arith.constant 1 : i32
    %1 = tpu.dynamic_rotate %0 by %c1_i32 dim 1 : vector<8x128xf32>, i32 -> vector<8x128xf32>
    %c0_1 = arith.constant 0 : index
    %c0_2 = arith.constant 0 : index
    %2 = vector.load %arg1[%c0_1, %c0_2] : memref<8x128xf32, #tpu.memory_space<vmem>>, vector<8x128xf32>
    tpu.vector_store %arg1[%c0_1, %c0_2], %1 {strides = array<i32>} : memref<8x128xf32, #tpu.memory_space<vmem>>, vector<8x128xf32>,
    return
  }
}

</mosaic_0001>

<bundles_post_ra>
// kernel: tpu_custom_call.1
= control target key start
LH: loop header
LB: loop body
LE: loop exit
PB: predicated region body
PF: predicated region fallthrough
CT: control target
= control target key end

     0   :  { %6 = vsyncpa [#allocation3], 0  ;;  %s106_s0 = inlined_call_operand.hbm [shape: f32[8,128], index: 0, kind: input, shape index: {}]   ;;  %s107_s1 = inlined_call_operand.hbm [shape: f32[8,128], index: 1, kind: output, shape index: {}]  }
   0x1   :  { %7 = vsyncpa [#allocation4], 0  ;;  %s87_s6 = smov [#allocation2]  }
   0x2   :  { %s14_s7 = sshll.u32 %s87_s6, 4  ;;  %s15_s7 = int_to_ptr.vmem [resolvable:$true] %s14_s7 }
   0x3   :  { %s51_s8 = scalar_lea.vmem %s15_s7, 128  ;;  %p56_p1 = scmp.lt.s32.totalorder %s15_s7, %s15_s7 }
   0x4   :  { %p52_p0 = scmp.ne.s32.totalorder %s15_s7, %s51_s8  ;;  %p57_p2 = scmp.lt.s32.totalorder %s51_s8, %s51_s8 }
   0x6   :  { %p58_p3 = por %p57_p2, %p56_p1 }
   0x8   :  { %p59_p4 = pnand %p58_p3, %p52_p0 }
   0xa   :  { %62 = shalt.err (!%p59_p4)
}
   0xb   :  { %17 = dma.hbm_to_vmem [thread:$0]  %s106_s0, 128, %s15_s7, [#allocation3]  }
   0xc   :  { %83 = dma.done.wait [#allocation3], 128  }
   0xd   :  { %84 = vsyncadd [#allocation3], 4294967168  ;;  %v21_v0 = vld [vmem:[#allocation2] sm:$0xff]  ;;  %s88_s11 = smov 1   ;;  %s89_s12 = smov [#allocation5]  }
   0xe   :  { %22 = vrot.lane.b32.xlu0 %v21_v0, %s88_s11  ;;  %s31_s13 = sshll.u32 %s89_s12, 4  ;;  %s32_s13 = int_to_ptr.vmem [resolvable:$true] %s31_s13 }
   0xf   :  { %s63_s14 = scalar_lea.vmem %s32_s13, 128  ;;  %p68_p6 = scmp.lt.s32.totalorder %s32_s13, %s32_s13 }
  0x10   :  { %p64_p5 = scmp.ne.s32.totalorder %s32_s13, %s63_s14  ;;  %p69_p7 = scmp.lt.s32.totalorder %s63_s14, %s63_s14 }
  0x12   :  { %p70_p8 = por %p69_p7, %p68_p6 }
  0x14   :  { %p71_p9 = pnand %p70_p8, %p64_p5 }
  0x80   :  { %v23_v1 = vpop.permute.xlu0 %22 }
  0x81   :  { %24 = vst [vmem:[#allocation5] sm:$0xff] %v23_v1 }
  0x82   :  { %74 = shalt.err (!%p71_p9)
}
  0x83   :  { %34 = dma.vmem_to_hbm [thread:$0]  %s32_s13, 128, %s107_s1, [#allocation4]  }
  0x84   :  { %85 = dma.done.wait [#allocation4], 128  }
  0x85   :  { %86 = vsyncadd [#allocation4], 4294967168 }
  0x86   :  { %38 = vsyncpa [#allocation3], 1 }
  0x87   :  { %39 = vsyncpa [#allocation4], 1 }

</bundles_post_ra>
